<compile_context>
chip_gen: v6e
topology: v6e:2x2x1
jax: 0.10.0
libtpu: 0.0.40
codegen_flags: <defaults>
</compile_context>

<pallas_src>
import numpy as np
import jax
import jax.numpy as jnp
from jax import lax
from jax.experimental import pallas as pl
from jax.experimental.pallas import tpu as pltpu


def _round_up(x, m):
    return ((x + m - 1) // m) * m


# ----------------------------------------------------------------------------
# Static index-table construction (depends only on shapes, like the cos/sin
# lookup tables built in the CUDA extension's host code).
# ----------------------------------------------------------------------------
def compute_r_index(H, W, numangle, numrho):
    """Returns r[a, y*W + x] int32 rho-bin index, shape [numangle, H*W]."""
    irho = float(int(np.sqrt(H * H + W * W) + 1)) / float(numrho - 1)
    itheta = np.pi / numangle
    angles = (np.arange(numangle, dtype=np.float32) * itheta).astype(np.float32)
    tab_cos = (np.cos(angles) / irho).astype(np.float32)
    tab_sin = (np.sin(angles) / irho).astype(np.float32)
    xs = np.arange(W, dtype=np.float32) - (W // 2)
    ys = np.arange(H, dtype=np.float32) - (H // 2)
    v = (xs[None, None, :] * tab_cos[:, None, None]
         + ys[None, :, None] * tab_sin[:, None, None])          # [A, H, W]
    # std::round semantics: half away from zero
    r = np.where(v >= 0.0, np.floor(v + 0.5), np.ceil(v - 0.5)).astype(np.int64)
    r = r + (numrho // 2)
    # With the standard irho formula all r land in [0, numrho); clip is only a
    # safety net.  (The CUDA kernel *drops* out-of-range bins instead of
    # clipping, but that path is never exercised for the reference irho.)
    r = np.clip(r, 0, numrho - 1)
    return r.reshape(numangle, H * W).astype(np.int32)


# ----------------------------------------------------------------------------
# Pallas kernel: per-angle on-the-fly one-hot scatter expressed as an MXU
# matmul, accumulated directly into the resident output block.
# ----------------------------------------------------------------------------
def _idht_kernel(acc_ref, r_ref, o_ref):
    # acc_ref: (1, tm, R)  f32 — accumulator rows for the current angle
    # r_ref:   (1, 1, tn)  i32 — rho index of the current angle for tn pixels
    # o_ref:   (tm, tn)    f32 — output tile, resident across the angle axis
    a = pl.program_id(2)

    @pl.when(a == 0)
    def _zero():
        o_ref[...] = jnp.zeros_like(o_ref)

    R = acc_ref.shape[-1]
    tn = r_ref.shape[-1]
    rho_iota = lax.broadcasted_iota(jnp.int32, (R, tn), 0)        # (R, tn)
    onehot = (rho_iota == r_ref[0]).astype(jnp.float32)           # (R, tn)
    o_ref[...] += jnp.dot(acc_ref[0], onehot,
                          preferred_element_type=jnp.float32)


def idht_pallas(acc_3d, r3, *, tm, tn):
    """acc_3d: [A, NCp, R] f32;  r3: [A, 1, HWp] i32  ->  [NCp, HWp] f32."""
    A, NCp, R = acc_3d.shape
    _, _, HWp = r3.shape
    assert NCp % tm == 0 and HWp % tn == 0
    n_i, n_j = NCp // tm, HWp // tn

    cost = pl.CostEstimate(
        flops=int(2 * NCp * A * R) * int(HWp),
        transcendentals=0,
        bytes_accessed=int(acc_3d.size) * 4 * n_j      # acc re-read per j tile
                       + int(r3.size) * 4               # index table
                       + int(NCp) * int(HWp) * 4,       # output writeback
    )

    return pl.pallas_call(
        _idht_kernel,
        out_shape=jax.ShapeDtypeStruct((NCp, HWp), jnp.float32),
        grid_spec=pltpu.PrefetchScalarGridSpec(
            num_scalar_prefetch=0,
            grid=(n_i, n_j, A),
            in_specs=[
                pl.BlockSpec((1, tm, R), lambda i, j, a: (a, i, 0)),
                pl.BlockSpec((1, 1, tn), lambda i, j, a: (a, 0, j)),
            ],
            out_specs=pl.BlockSpec((tm, tn), lambda i, j, a: (i, j)),
        ),
        compiler_params=pltpu.CompilerParams(
            dimension_semantics=("parallel", "parallel", "arbitrary")),
        cost_estimate=cost,
    )(acc_3d, r3)


# ----------------------------------------------------------------------------
# Module wrapper (mirrors torch C_idht forward).
# ----------------------------------------------------------------------------
class CIDHTPallas:
    def __init__(self, numangle, numrho, out_H=64, out_W=64):
        self.numangle = numangle
        self.numrho = numrho
        self.out_H = out_H
        self.out_W = out_W

        HW = out_H * out_W
        self.HW = HW
        HWp = _round_up(HW, 128)
        self.HWp = HWp

        # Output-tile width: as large as possible (amortizes per-step overhead)
        # while keeping >= 2 j-blocks when we can (v7x megacore sharding).
        candidates = (2048, 1024, 512, 256, 128)
        tn = next((t for t in candidates if HWp % t == 0 and HWp // t >= 2), None)
        if tn is None:
            tn = next(t for t in candidates if HWp % t == 0)
        self.tn = tn

        # Compact int32 rho-index table (numrho x smaller than a dense one-hot
        # matrix) — the only shape-derived constant streamed into the kernel.
        r = compute_r_index(out_H, out_W, numangle, numrho)       # [A, HW]
        if HWp != HW:
            r = np.pad(r, ((0, 0), (0, HWp - HW)))
        self.r3 = jnp.asarray(r.reshape(numangle, 1, HWp))        # [A, 1, HWp]

    def __call__(self, accumulator):
        N, C, A, R = accumulator.shape
        assert A == self.numangle and R == self.numrho
        NC = N * C

        # [N, C, A, R] -> [A, N*C, R] so the per-angle slice is a leading-axis
        # block (no dynamic lane slicing inside the kernel).
        acc = accumulator.astype(jnp.float32).reshape(NC, A, R)
        acc = jnp.transpose(acc, (1, 0, 2))                       # [A, NC, R]

        # Row tiling: keep the MXU row block as full as possible without
        # inflating output writeback for tiny N*C.
        if NC >= 128:
            NCp, tm = _round_up(NC, 128), 128
        else:
            NCp = _round_up(NC, 8)
            tm = NCp
        if NCp != NC:
            acc = jnp.pad(acc, ((0, 0), (0, NCp - NC), (0, 0)))

        out = idht_pallas(acc, self.r3, tm=tm, tn=self.tn)        # [NCp, HWp]
        out = out[:NC, :self.HW]
        return out.reshape(N, C, self.out_H, self.out_W)


# ----------------------------------------------------------------------------
# Demo / correctness check.
# ----------------------------------------------------------------------------
if __name__ == "__main__":
    N, C = 2, 4
    numangle, numrho = 16, 16
    out_H, out_W = 32, 32

    key = jax.random.PRNGKey(0)
    accumulator = jax.random.normal(key, (N, C, numangle, numrho), dtype=jnp.float32)

    mod = CIDHTPallas(numangle, numrho, out_H=out_H, out_W=out_W)
    fwd = jax.jit(mod.__call__)
    out = jax.block_until_ready(fwd(accumulator))
    assert out.shape == (N, C, out_H, out_W)

    # Plain-numpy reference: gather-sum over angles.
    r_idx = compute_r_index(out_H, out_W, numangle, numrho)       # [A, HW]
    acc_np = np.asarray(accumulator)
    ref = np.zeros((N, C, out_H * out_W), dtype=np.float32)
    for a in range(numangle):
        ref += acc_np[:, :, a, r_idx[a]]
    ref = ref.reshape(N, C, out_H, out_W)

    np.testing.assert_allclose(np.asarray(out), ref, rtol=1e-4, atol=1e-4)
    print("KERNEL_OK")
</pallas_src>

<mosaic_0001>
module attributes {stable_mosaic.version = 11 : i64} {
  func.func @_idht_kernel(%arg0: i32, %arg1: i32, %arg2: i32, %arg3: memref<1x8x16xf32, #tpu.memory_space<vmem>>, %arg4: memref<1x1x512xi32, #tpu.memory_space<vmem>>, %arg5: memref<8x512xf32, #tpu.memory_space<vmem>>) attributes {dimension_semantics = [#tpu.dimension_semantics<parallel>, #tpu.dimension_semantics<parallel>, #tpu.dimension_semantics<arbitrary>], iteration_bounds = array<i64: 1, 2, 16>, scalar_prefetch = 0 : i64, scratch_operands = 0 : i64, tpu.core_type = #tpu.core_type<tc>, window_params = [{transform_indices = @transform_0, window_bounds = array<i64: 1, 8, 16>}, {transform_indices = @transform_1, window_bounds = array<i64: 1, 1, 512>}, {transform_indices = @transform_2, window_bounds = array<i64: 8, 512>}]} {
    %c0_i32 = arith.constant 0 : i32
    %0 = arith.cmpi eq, %arg2, %c0_i32 : i32
    %1 = arith.extui %0 : i1 to i32
    %c0_i32_0 = arith.constant 0 : i32
    %2 = arith.cmpi ne, %1, %c0_i32_0 : i32
    scf.if %2 {
      %cst_10 = arith.constant 0.000000e+00 : f32
      %16 = vector.broadcast %cst_10 : f32 to vector<8x512xf32>
      %c0_11 = arith.constant 0 : index
      %c0_12 = arith.constant 0 : index
      %17 = vector.load %arg5[%c0_11, %c0_12] : memref<8x512xf32, #tpu.memory_space<vmem>>, vector<8x512xf32>
      tpu.vector_store %arg5[%c0_11, %c0_12], %16 {strides = array<i32>} : memref<8x512xf32, #tpu.memory_space<vmem>>, vector<8x512xf32>,
    } else {
    }
    %3 = tpu.iota {dimensions = array<i32: 0>} : vector<16x512xi32>
    %c0 = arith.constant 0 : index
    %c0_1 = arith.constant 0 : index
    %c0_2 = arith.constant 0 : index
    %4 = vector.load %arg4[%c0, %c0_1, %c0_2] : memref<1x1x512xi32, #tpu.memory_space<vmem>>, vector<1x1x512xi32>
    %5 = vector.shape_cast %4 : vector<1x1x512xi32> to vector<1x512xi32>
    %6 = vector.broadcast %5 : vector<1x512xi32> to vector<16x512xi32>
    %7 = arith.cmpi eq, %3, %6 : vector<16x512xi32>
    %8 = arith.extui %7 : vector<16x512xi1> to vector<16x512xi32>
    %9 = arith.sitofp %8 : vector<16x512xi32> to vector<16x512xf32>
    %c0_3 = arith.constant 0 : index
    %c0_4 = arith.constant 0 : index
    %10 = vector.load %arg5[%c0_3, %c0_4] : memref<8x512xf32, #tpu.memory_space<vmem>>, vector<8x512xf32>
    %c0_5 = arith.constant 0 : index
    %c0_6 = arith.constant 0 : index
    %c0_7 = arith.constant 0 : index
    %11 = vector.load %arg3[%c0_5, %c0_6, %c0_7] : memref<1x8x16xf32, #tpu.memory_space<vmem>>, vector<1x8x16xf32>
    %12 = vector.shape_cast %11 : vector<1x8x16xf32> to vector<8x16xf32>
    %cst = arith.constant dense<0.000000e+00> : vector<8x512xf32>
    %13 = tpu.matmul %12, %9, %cst {dimension_numbers = #tpu.dot_dimension_numbers<[1], [0], [0], [1], [0, 0, 1, 1], [], []>} : vector<8x16xf32>, vector<16x512xf32>, vector<8x512xf32> -> vector<8x512xf32>
    %14 = arith.addf %10, %13 : vector<8x512xf32>
    %c0_8 = arith.constant 0 : index
    %c0_9 = arith.constant 0 : index
    %15 = vector.load %arg5[%c0_8, %c0_9] : memref<8x512xf32, #tpu.memory_space<vmem>>, vector<8x512xf32>
    tpu.vector_store %arg5[%c0_8, %c0_9], %14 {strides = array<i32>} : memref<8x512xf32, #tpu.memory_space<vmem>>, vector<8x512xf32>,
    return
  }
  func.func @transform_0(%arg0: i32, %arg1: i32, %arg2: i32) -> (i32, i32, i32) {
    %c0_i32 = arith.constant 0 : i32
    %c0_i32_0 = arith.constant 0 : i32
    return %arg2, %arg0, %c0_i32 : i32, i32, i32
  }
  func.func @transform_1(%arg0: i32, %arg1: i32, %arg2: i32) -> (i32, i32, i32) {
    %c0_i32 = arith.constant 0 : i32
    %c0_i32_0 = arith.constant 0 : i32
    return %arg2, %c0_i32, %arg1 : i32, i32, i32
  }
  func.func @transform_2(%arg0: i32, %arg1: i32, %arg2: i32) -> (i32, i32) {
    %c0_i32 = arith.constant 0 : i32
    return %arg0, %arg1 : i32, i32
  }
}

</mosaic_0001>

<bundles_post_ra>
// kernel: a_call__.1
= control target key start
LH: loop header
LB: loop body
LE: loop exit
PB: predicated region body
PF: predicated region fallthrough
CT: control target
= control target key end

     0   :  { %s663_s9 = smov 0   ;;  %s665_s10 = smov 0   ;;  %s734_s0 = inlined_call_operand.vmem [shape: f32[16,8,16], index: 0, kind: input, shape index: {}]   ;;  %s735_s1 = inlined_call_operand.vmem [shape: s32[16,1,1024], index: 1, kind: input, shape index: {}]   ;;  %s736_s2 = inlined_call_operand.vmem [shape: f32[8,1024], index: 2, kind: output, shape index: {}]  }
   0x1   :  { %s667_s11 = smov 0   ;;  %s669_s12 = smov 0  }
   0x2   :  { %s671_s13 = smov 0  }
   0x3 LB: > { %s24_s14 = sadd.s32 1, %s635_s11  ;;  %s27_s15 = sadd.s32 1, %s639_s12  ;;  %s643_s13 = sphi %s671_s13, %s12_s13   ;;  %s639_s12 = sphi %s669_s12, %s740_s12   ;;  %s635_s11 = sphi %s667_s11, %s739_s11   ;;  %s631_s10 = sphi %s665_s10, %s738_s10   ;;  %s627_s9 = sphi %s663_s9, %s737_s9  }
   0x4   : > { %p25_p0 = scmp.ge.s32.totalorder %s24_s14, 16  ;;  %p535_p1 = scmp.ge.s32.totalorder %s643_s13, 1 }
   0x5   : > { %p153_p2 = scmp.lt.s32.totalorder %s643_s13, 33 }
   0x6   : > { %s742_s14 = smov (%p25_p0, %s24_s14), 0  ;;  %s744_s15 = smov (!%p25_p0, %s27_s15), %s639_s12 }
   0x7   : > { %p154_p3 = pnand %p535_p1, %p153_p2  ;;  %p29_p4 = scmp.ge.s32.totalorder %s744_s15, 2 }
   0x8   : > { %p189_p5 = scmp.lt.s32.totalorder (!%p154_p3), %s627_s9, 15  ;;  %s537_s16 = sshll.u32 (!%p154_p3), %s631_s10, 2 }
   0x9   : > { %s746_s15 = smov (%p29_p4, %s744_s15), 0  ;;  %157 = sbr.rel (%p154_p3) target bundleno = 234 (0xea), region = 28 }
   0xa   : > { %p199_p6 = scmp.lt.s32.totalorder (!%p154_p3), %s537_s16, 7  ;;  %p541_p7 = scmp.ne.s32.totalorder (!%p154_p3), %s627_s9, 0 }
   0xe   : > { %s190_s17 = scalar_select %p189_p5, %s627_s9, 15 }
   0xf   : > { %s748_s16 = smov (!%p199_p6, %s537_s16), 7  ;;  %218 = sbr.rel (%p541_p7) target bundleno = 23 (0x17), region = 32 }
  0x10   : > { %s536_s18 = sshll.u32 %s190_s17, 3  ;;  %s540_s26 = sshll.u32 %s748_s16, 3 }
  0x11   : > { %s696_s21 = scalar_lea.vmem %s734_s0, %s536_s18  ;;  %s202_s22 = sadd.s32 %s536_s18, %s748_s16 }
  0x12   : > { %s203_s25 = scalar_lea.vmem %s735_s1, %s202_s22  ;;  %s704_s29 = scalar_lea.vmem %s736_s2, %s540_s26 }
  0x14   : > { %v645_v0 = vmov 0.0  }
  0x15   : > { %219 = vst [vmem:[%s704_s29] sm:$0xff] %v645_v0  ;;  %220 = vst [vmem:[%s704_s29 + $0x8] sm:$0xff] %v645_v0 }
  0x16   : > { %221 = vst [vmem:[%s704_s29 + $0x10] sm:$0xff] %v645_v0  ;;  %222 = vst [vmem:[%s704_s29 + $0x18] sm:$0xff] %v645_v0 }
  0x17 PF: > { %v223_v1 = vlaneseq  ;;  %v646_v2 = vmov 0.0   ;;  %v226_v4 = vld [vmem:[%s203_s25] sm:$0xf]  ;;  %v647_v14 = vmov 1.0   ;;  %vm272_vm8 = vcmask 130048  }
  0x18   : > { %340 = vmatprep.mubr.f32.mxu0 %v646_v2  ;;  %411 = vmatprep.mubr.f32.mxu1 %v646_v2  ;;  %v271_v15 = vld [vmem:[%s696_s21] sm:$0xff] }
  0x19   : > { %v224_v3 = vshrl.u32 %v223_v1, 7 }
  0x1b   : > { %v225_v5 = vadd.s32 8, %v224_v3  ;;  %v233_v6 = vsub.s32 1, %v224_v3  ;;  %v241_v7 = vsub.s32 3, %v224_v3  ;;  %v229_v8 = vsub.s32 0, %v224_v3 }
  0x1c   : > { %v237_v9 = vsub.s32 2, %v224_v3  ;;  %v267_v16 = vld [vmem:[%s704_s29] sm:$0xff]  ;;  %v268_v20 = vld [vmem:[%s704_s29 + $0x8] sm:$0xff] }
  0x1d   : > { %v234_v10 = vrot.slane %v226_v4, %v233_v6  ;;  %v242_v11 = vrot.slane %v226_v4, %v241_v7  ;;  %v230_v12 = vrot.slane %v226_v4, %v229_v8  ;;  %v269_v17 = vld [vmem:[%s704_s29 + $0x10] sm:$0xff]  ;;  %v270_v21 = vld [vmem:[%s704_s29 + $0x18] sm:$0xff] }
  0x1e   : > { %v238_v13 = vrot.slane %v226_v4, %v237_v9 }
  0x1f   : > { %vm248_vm0 = vcmp.eq.s32.totalorder %v225_v5, %v234_v10  ;;  %vm250_vm1 = vcmp.eq.s32.totalorder %v225_v5, %v242_v11  ;;  %vm247_vm2 = vcmp.eq.s32.totalorder %v225_v5, %v230_v12  ;;  %vm244_vm3 = vcmp.eq.s32.totalorder %v224_v3, %v234_v10 }
  0x20   : > { %550 = vmatprep.subr.msk.mxu0 %vm248_vm0, %v647_v14  ;;  %555 = vmatprep.subr.msk.mxu1 %vm250_vm1, %v647_v14  ;;  %vm249_vm4 = vcmp.eq.s32.totalorder %v225_v5, %v238_v13  ;;  %vm246_vm5 = vcmp.eq.s32.totalorder %v224_v3, %v242_v11  ;;  %vm243_vm6 = vcmp.eq.s32.totalorder %v224_v3, %v230_v12 }
  0x21   : > { %551 = vmatpush1.msk.msra.mxu0 %vm247_vm2, %v647_v14  ;;  %556 = vmatpush1.msk.msra.mxu1 %vm249_vm4, %v647_v14  ;;  %vm245_vm7 = vcmp.eq.s32.totalorder %v224_v3, %v238_v13 }
  0x22   : > { %552 = vmatprep.subr.msk.mxu0 %vm244_vm3, %v647_v14  ;;  %557 = vmatprep.subr.msk.mxu1 %vm246_vm5, %v647_v14 }
  0x23   : > { %553 = vmatpush1.msk.msra.mxu0 %vm243_vm6, %v647_v14  ;;  %558 = vmatpush1.msk.msra.mxu1 %vm245_vm7, %v647_v14 }
  0x24   : > { %554 = vmatmul.mubr.msk.f32.vlgmr.msra.gmra.mxu0 %vm272_vm8, %v271_v15  ;;  %559 = vmatmul.mubr.msk.f32.vlgmr.msra.gmra.mxu1 %vm272_vm8, %v271_v15 }
  0xe4   : > { %v342_v18 = vpop.f32.mrf.mxu0  ;;  %v413_v19 = vpop.f32.mrf.mxu1 }
  0xe5   : > { %v418_v22 = vadd.f32 %v342_v18, %v267_v16  ;;  %v420_v23 = vadd.f32 %v413_v19, %v269_v17 }
  0xe6   : > { %v344_v24 = vpop.f32.mrf.mxu0  ;;  %v415_v25 = vpop.f32.mrf.mxu1 }
  0xe7   : > { %v419_v26 = vadd.f32 %v344_v24, %v268_v20  ;;  %422 = vst [vmem:[%s704_s29] sm:$0xff] %v418_v22  ;;  %v421_v27 = vadd.f32 %v415_v25, %v270_v21  ;;  %424 = vst [vmem:[%s704_s29 + $0x10] sm:$0xff] %v420_v23 }
  0xe9   : > { %423 = vst [vmem:[%s704_s29 + $0x8] sm:$0xff] %v419_v26  ;;  %425 = vst [vmem:[%s704_s29 + $0x18] sm:$0xff] %v421_v27 }
  0xea PF: > { %s12_s13 = sadd.s32 1, %s643_s13   ;;  %s737_s9 = smov %s635_s11 }
  0xeb   : > { %p9_p8 = scmp.ge.s32.totalorder %s12_s13, 34   ;;  %s738_s10 = smov %s639_s12 }
  0xec   : > { %s739_s11 = smov %s742_s14  ;;  %s740_s12 = smov %s746_s15 }
  0xed   :  { %11 = sbr.rel (!%p9_p8) target bundleno = 3 (0x3), region = 65 }

</bundles_post_ra>
